<compile_context>
chip_gen: v5e
topology: v5e:2x2
jax: 0.10.0
libtpu: 0.0.40
codegen_flags: <defaults>
</compile_context>

<pallas_src>
import functools
import math

import jax
import jax.numpy as jnp
from jax.experimental import pallas as pl
from jax.experimental.pallas import tpu as pltpu


def _upsample_conv_kernel(x_ref, w_ref, b_ref, o_ref, *, h, w):
    # x_ref : (nb, C, H*W)      raw NCHW input, spatial flattened on the lane dim
    # w_ref : (4C, 9C)          sub-pixel weight slab, rows (py,px,cout), cols (ky,kx,cin)
    # b_ref : (4C, 1)           bias column per (py,px,cout) row
    # o_ref : (nb, 4C, H*W)     lane-dense output (H*W on lanes)
    nb, c, hw = x_ref.shape

    # Border-validity masks on the flattened (y*W + x) lane index.
    fi = jax.lax.broadcasted_iota(jnp.int32, (c, hw), 1)
    if (w & (w - 1)) == 0:
        xw = jnp.bitwise_and(fi, w - 1)          # fi % w, pow2 fast path (VPU)
    else:
        xw = jax.lax.rem(fi, w)                  # generic path (non-pow2 width)
    row_ok = {-1: fi >= w, 0: None, 1: fi < (h - 1) * w}
    col_ok = {-1: xw >= 1, 0: None, 1: xw < (w - 1)}

    ims = []
    for b in range(nb):                          # static unroll over images in this block
        xb = x_ref[b]                            # (C, H*W) -- loaded once
        taps = []
        for ky in range(3):
            dy = ky - 1
            for kx in range(3):
                dx = kx - 1
                s = dy * w + dx                  # flat-index shift for this tap
                win = xb if s == 0 else jnp.roll(xb, -s, axis=-1)
                cond = row_ok[dy]
                if col_ok[dx] is not None:
                    cond = col_ok[dx] if cond is None else (cond & col_ok[dx])
                if cond is not None:             # zero the 1-pixel conv padding ring
                    win = jnp.where(cond, win, jnp.zeros_like(win))
                taps.append(win)                 # (C, H*W)
        ims.append(jnp.concatenate(taps, axis=0))        # (9C, H*W), rows (ky,kx,cin)

    im = ims[0] if nb == 1 else jnp.concatenate(ims, axis=1)   # (9C, nb*H*W)

    # Single MXU push: all 9 taps x 4 phases x all images at once (f32 acc).
    acc = jnp.dot(w_ref[...], im, preferred_element_type=jnp.float32)  # (4C, nb*H*W)
    acc = acc + b_ref[...].astype(jnp.float32)
    out = acc.astype(o_ref.dtype)

    for b in range(nb):                          # lane-aligned dense stores
        o_ref[b] = out[:, b * hw:(b + 1) * hw]


def _subpixel_weight_slab(w_oihw):
    """Fold the nearest-2x upsample into the 3x3 conv weights.

    Output pixel (2y+py, 2x+px) of conv(upsample2x(x), pad=1) reads the
    1-padded ORIGINAL image at rows y + M[py, dy], cols x + M[px, dx] with
    M[0] = [0,1,1], M[1] = [1,1,2].  Summing W over the (dy, dx) that map to
    the same tap yields a (9C, 4C) slab; we return its transpose (4C, 9C) so
    the kernel matmul puts H*W (not C) on the lane dimension.
    """
    c_out, c_in, _, _ = w_oihw.shape
    w_hwio = jnp.transpose(w_oihw, (2, 3, 1, 0))          # (dy, dx, cin, cout)
    s0 = jnp.array([[1., 0., 0.],
                    [0., 1., 1.],
                    [0., 0., 0.]], w_oihw.dtype)          # phase 0: dy -> tap [0,1,1]
    s1 = jnp.array([[0., 0., 0.],
                    [1., 1., 0.],
                    [0., 0., 1.]], w_oihw.dtype)          # phase 1: dy -> tap [1,1,2]
    s = jnp.stack([s0, s1])                               # (phase, tap, d)
    # wbig[ky, kx, cin, py, px, cout]
    wbig = jnp.einsum('pyd,qxe,deio->yxipqo', s, s, w_hwio)
    slab = wbig.reshape(9 * c_in, 4 * c_out)              # rows (ky,kx,cin), cols (py,px,cout)
    return slab.T                                         # (4C, 9C)


def _batch_per_step(n):
    """Images per grid step.

    Multi-TensorCore chips (v4/v5p megacore, v7x): 1 image/step so the
    "parallel" grid axis feeds both cores.  Single-TC chips (v5e/v6e): fold
    the whole batch into one step / one MXU push (per-step overhead dominates
    at this tiny size).
    """
    if n <= 1:
        return max(n, 1)
    try:
        kind = jax.devices()[0].device_kind.lower()
    except Exception:
        kind = ""
    multi_tc = ("v7" in kind) or ("v4" in kind) or ("v5p" in kind)
    return 1 if multi_tc else n


@jax.jit
def upsample_forward(x_nchw, w_oihw, bias):
    """x_nchw: (N, C, H, W); w_oihw: (C, C, 3, 3); bias: (C,) — PyTorch layouts."""
    n, c, h, w = x_nchw.shape
    hw = h * w

    x_flat = x_nchw.reshape(n, c, hw)                     # free (contiguous) reshape
    wslab_t = _subpixel_weight_slab(w_oihw)               # (4C, 9C)
    bcol = jnp.tile(bias, 4).reshape(4 * c, 1)            # per (py,px,cout) row

    nb = _batch_per_step(n)
    grid = (n // nb,)
    kernel = functools.partial(_upsample_conv_kernel, h=h, w=w)

    out_pl = pl.pallas_call(
        kernel,
        out_shape=jax.ShapeDtypeStruct((n, 4 * c, hw), x_nchw.dtype),
        grid_spec=pltpu.PrefetchScalarGridSpec(
            num_scalar_prefetch=0,
            grid=grid,
            in_specs=[
                pl.BlockSpec((nb, c, hw), lambda i: (i, 0, 0)),
                pl.BlockSpec((4 * c, 9 * c), lambda i: (0, 0)),
                pl.BlockSpec((4 * c, 1), lambda i: (0, 0)),
            ],
            out_specs=pl.BlockSpec((nb, 4 * c, hw), lambda i: (i, 0, 0)),
        ),
        compiler_params=pltpu.CompilerParams(
            dimension_semantics=("parallel",)),
    )(x_flat, wslab_t, bcol)

    # Interleave the 4 phases and produce NCHW (output-sized, unavoidable).
    out6 = out_pl.reshape(n, 2, 2, c, h, w)               # (n, py, px, co, y, x)
    return jnp.transpose(out6, (0, 3, 4, 1, 5, 2)).reshape(n, c, 2 * h, 2 * w)


def _reference(x_nchw, w_oihw, bias):
    """Plain-JAX reference of the PyTorch forward (for verification only)."""
    xu = jnp.repeat(jnp.repeat(x_nchw, 2, axis=2), 2, axis=3)
    out = jax.lax.conv_general_dilated(
        xu, w_oihw, window_strides=(1, 1), padding=((1, 1), (1, 1)),
        dimension_numbers=("NCHW", "OIHW", "NCHW"))
    return out + bias.reshape(1, -1, 1, 1)


if __name__ == "__main__":
    key = jax.random.PRNGKey(0)
    kx, kw, kb = jax.random.split(key, 3)

    N, C, H, W = 2, 4, 16, 16
    x = jax.random.normal(kx, (N, C, H, W), dtype=jnp.float32)

    # Deterministic Conv2d(in_channel, in_channel, 3, 1, 1) init
    # (mimics PyTorch default: uniform(-1/sqrt(fan_in), 1/sqrt(fan_in))).
    fan_in = C * 3 * 3
    bound = 1.0 / math.sqrt(fan_in)
    w_oihw = jax.random.uniform(kw, (C, C, 3, 3), jnp.float32, -bound, bound)
    bias = jax.random.uniform(kb, (C,), jnp.float32, -bound, bound)

    out = jax.block_until_ready(upsample_forward(x, w_oihw, bias))

    ref = _reference(x, w_oihw, bias)
    assert out.shape == (N, C, 2 * H, 2 * W), out.shape
    assert jnp.allclose(out, ref, atol=1e-5, rtol=1e-5), \
        float(jnp.max(jnp.abs(out - ref)))

    print("KERNEL_OK")
</pallas_src>

<mosaic_0001>
module attributes {stable_mosaic.version = 11 : i64} {
  func.func @_upsample_conv_kernel(%arg0: i32, %arg1: memref<2x4x256xf32, #tpu.memory_space<vmem>>, %arg2: memref<16x36xf32, #tpu.memory_space<vmem>>, %arg3: memref<16x1xf32, #tpu.memory_space<vmem>>, %arg4: memref<2x16x256xf32, #tpu.memory_space<vmem>>) attributes {dimension_semantics = [#tpu.dimension_semantics<parallel>], iteration_bounds = array<i64: 1>, scalar_prefetch = 0 : i64, scratch_operands = 0 : i64, tpu.core_type = #tpu.core_type<tc>, window_params = [{transform_indices = @transform_0, window_bounds = array<i64: 2, 4, 256>}, {pipeline_mode = #tpu.pipeline_mode<synchronous>, transform_indices = @transform_1, window_bounds = array<i64: 16, 36>}, {pipeline_mode = #tpu.pipeline_mode<synchronous>, transform_indices = @transform_2, window_bounds = array<i64: 16, 1>}, {transform_indices = @transform_3, window_bounds = array<i64: 2, 16, 256>}]} {
    %0 = tpu.iota {dimensions = array<i32: 1>} : vector<4x256xi32>
    %c15_i32 = arith.constant 15 : i32
    %1 = vector.broadcast %c15_i32 : i32 to vector<4x256xi32>
    %2 = arith.andi %0, %1 : vector<4x256xi32>
    %c16_i32 = arith.constant 16 : i32
    %3 = vector.broadcast %c16_i32 : i32 to vector<4x256xi32>
    %4 = arith.cmpi sge, %0, %3 : vector<4x256xi32>
    %c240_i32 = arith.constant 240 : i32
    %5 = vector.broadcast %c240_i32 : i32 to vector<4x256xi32>
    %6 = arith.cmpi slt, %0, %5 : vector<4x256xi32>
    %c1_i32 = arith.constant 1 : i32
    %7 = vector.broadcast %c1_i32 : i32 to vector<4x256xi32>
    %8 = arith.cmpi sge, %2, %7 : vector<4x256xi32>
    %c15_i32_0 = arith.constant 15 : i32
    %9 = vector.broadcast %c15_i32_0 : i32 to vector<4x256xi32>
    %10 = arith.cmpi slt, %2, %9 : vector<4x256xi32>
    %c0 = arith.constant 0 : index
    %c0_1 = arith.constant 0 : index
    %c0_2 = arith.constant 0 : index
    %11 = vector.load %arg1[%c0, %c0_1, %c0_2] : memref<2x4x256xf32, #tpu.memory_space<vmem>>, vector<1x4x256xf32>
    %12 = vector.shape_cast %11 : vector<1x4x256xf32> to vector<4x256xf32>
    %13 = vector.extract_strided_slice %12 {offsets = [0, 239], sizes = [4, 17], strides = [1, 1]} : vector<4x256xf32> to vector<4x17xf32>
    %14 = vector.extract_strided_slice %12 {offsets = [0, 0], sizes = [4, 239], strides = [1, 1]} : vector<4x256xf32> to vector<4x239xf32>
    %15 = tpu.concatenate %13, %14 in 1 : vector<4x17xf32>, vector<4x239xf32> -> vector<4x256xf32>
    %16 = arith.andi %4, %8 : vector<4x256xi1>
    %cst = arith.constant 0.000000e+00 : f32
    %17 = vector.broadcast %cst : f32 to vector<4x256xf32>
    %18 = arith.select %16, %15, %17 : vector<4x256xi1>, vector<4x256xf32>
    %19 = vector.extract_strided_slice %12 {offsets = [0, 240], sizes = [4, 16], strides = [1, 1]} : vector<4x256xf32> to vector<4x16xf32>
    %20 = vector.extract_strided_slice %12 {offsets = [0, 0], sizes = [4, 240], strides = [1, 1]} : vector<4x256xf32> to vector<4x240xf32>
    %21 = tpu.concatenate %19, %20 in 1 : vector<4x16xf32>, vector<4x240xf32> -> vector<4x256xf32>
    %cst_3 = arith.constant 0.000000e+00 : f32
    %22 = vector.broadcast %cst_3 : f32 to vector<4x256xf32>
    %23 = arith.select %4, %21, %22 : vector<4x256xi1>, vector<4x256xf32>
    %24 = vector.extract_strided_slice %12 {offsets = [0, 241], sizes = [4, 15], strides = [1, 1]} : vector<4x256xf32> to vector<4x15xf32>
    %25 = vector.extract_strided_slice %12 {offsets = [0, 0], sizes = [4, 241], strides = [1, 1]} : vector<4x256xf32> to vector<4x241xf32>
    %26 = tpu.concatenate %24, %25 in 1 : vector<4x15xf32>, vector<4x241xf32> -> vector<4x256xf32>
    %27 = arith.andi %4, %10 : vector<4x256xi1>
    %cst_4 = arith.constant 0.000000e+00 : f32
    %28 = vector.broadcast %cst_4 : f32 to vector<4x256xf32>
    %29 = arith.select %27, %26, %28 : vector<4x256xi1>, vector<4x256xf32>
    %30 = vector.extract_strided_slice %12 {offsets = [0, 255], sizes = [4, 1], strides = [1, 1]} : vector<4x256xf32> to vector<4x1xf32>
    %31 = vector.extract_strided_slice %12 {offsets = [0, 0], sizes = [4, 255], strides = [1, 1]} : vector<4x256xf32> to vector<4x255xf32>
    %32 = tpu.concatenate %30, %31 in 1 : vector<4x1xf32>, vector<4x255xf32> -> vector<4x256xf32>
    %cst_5 = arith.constant 0.000000e+00 : f32
    %33 = vector.broadcast %cst_5 : f32 to vector<4x256xf32>
    %34 = arith.select %8, %32, %33 : vector<4x256xi1>, vector<4x256xf32>
    %35 = vector.extract_strided_slice %12 {offsets = [0, 1], sizes = [4, 255], strides = [1, 1]} : vector<4x256xf32> to vector<4x255xf32>
    %36 = vector.extract_strided_slice %12 {offsets = [0, 0], sizes = [4, 1], strides = [1, 1]} : vector<4x256xf32> to vector<4x1xf32>
    %37 = tpu.concatenate %35, %36 in 1 : vector<4x255xf32>, vector<4x1xf32> -> vector<4x256xf32>
    %cst_6 = arith.constant 0.000000e+00 : f32
    %38 = vector.broadcast %cst_6 : f32 to vector<4x256xf32>
    %39 = arith.select %10, %37, %38 : vector<4x256xi1>, vector<4x256xf32>
    %40 = vector.extract_strided_slice %12 {offsets = [0, 15], sizes = [4, 241], strides = [1, 1]} : vector<4x256xf32> to vector<4x241xf32>
    %41 = vector.extract_strided_slice %12 {offsets = [0, 0], sizes = [4, 15], strides = [1, 1]} : vector<4x256xf32> to vector<4x15xf32>
    %42 = tpu.concatenate %40, %41 in 1 : vector<4x241xf32>, vector<4x15xf32> -> vector<4x256xf32>
    %43 = arith.andi %6, %8 : vector<4x256xi1>
    %cst_7 = arith.constant 0.000000e+00 : f32
    %44 = vector.broadcast %cst_7 : f32 to vector<4x256xf32>
    %45 = arith.select %43, %42, %44 : vector<4x256xi1>, vector<4x256xf32>
    %46 = vector.extract_strided_slice %12 {offsets = [0, 16], sizes = [4, 240], strides = [1, 1]} : vector<4x256xf32> to vector<4x240xf32>
    %47 = vector.extract_strided_slice %12 {offsets = [0, 0], sizes = [4, 16], strides = [1, 1]} : vector<4x256xf32> to vector<4x16xf32>
    %48 = tpu.concatenate %46, %47 in 1 : vector<4x240xf32>, vector<4x16xf32> -> vector<4x256xf32>
    %cst_8 = arith.constant 0.000000e+00 : f32
    %49 = vector.broadcast %cst_8 : f32 to vector<4x256xf32>
    %50 = arith.select %6, %48, %49 : vector<4x256xi1>, vector<4x256xf32>
    %51 = vector.extract_strided_slice %12 {offsets = [0, 17], sizes = [4, 239], strides = [1, 1]} : vector<4x256xf32> to vector<4x239xf32>
    %52 = vector.extract_strided_slice %12 {offsets = [0, 0], sizes = [4, 17], strides = [1, 1]} : vector<4x256xf32> to vector<4x17xf32>
    %53 = tpu.concatenate %51, %52 in 1 : vector<4x239xf32>, vector<4x17xf32> -> vector<4x256xf32>
    %54 = arith.andi %6, %10 : vector<4x256xi1>
    %cst_9 = arith.constant 0.000000e+00 : f32
    %55 = vector.broadcast %cst_9 : f32 to vector<4x256xf32>
    %56 = arith.select %54, %53, %55 : vector<4x256xi1>, vector<4x256xf32>
    %57 = tpu.concatenate %18, %23, %29, %34, %12, %39, %45, %50, %56 in 0 : vector<4x256xf32>, vector<4x256xf32>, vector<4x256xf32>, vector<4x256xf32>, vector<4x256xf32>, vector<4x256xf32>, vector<4x256xf32>, vector<4x256xf32>, vector<4x256xf32> -> vector<36x256xf32>
    %c1 = arith.constant 1 : index
    %c0_10 = arith.constant 0 : index
    %c0_11 = arith.constant 0 : index
    %58 = vector.load %arg1[%c1, %c0_10, %c0_11] : memref<2x4x256xf32, #tpu.memory_space<vmem>>, vector<1x4x256xf32>
    %59 = vector.shape_cast %58 : vector<1x4x256xf32> to vector<4x256xf32>
    %60 = vector.extract_strided_slice %59 {offsets = [0, 239], sizes = [4, 17], strides = [1, 1]} : vector<4x256xf32> to vector<4x17xf32>
    %61 = vector.extract_strided_slice %59 {offsets = [0, 0], sizes = [4, 239], strides = [1, 1]} : vector<4x256xf32> to vector<4x239xf32>
    %62 = tpu.concatenate %60, %61 in 1 : vector<4x17xf32>, vector<4x239xf32> -> vector<4x256xf32>
    %63 = arith.andi %4, %8 : vector<4x256xi1>
    %cst_12 = arith.constant 0.000000e+00 : f32
    %64 = vector.broadcast %cst_12 : f32 to vector<4x256xf32>
    %65 = arith.select %63, %62, %64 : vector<4x256xi1>, vector<4x256xf32>
    %66 = vector.extract_strided_slice %59 {offsets = [0, 240], sizes = [4, 16], strides = [1, 1]} : vector<4x256xf32> to vector<4x16xf32>
    %67 = vector.extract_strided_slice %59 {offsets = [0, 0], sizes = [4, 240], strides = [1, 1]} : vector<4x256xf32> to vector<4x240xf32>
    %68 = tpu.concatenate %66, %67 in 1 : vector<4x16xf32>, vector<4x240xf32> -> vector<4x256xf32>
    %cst_13 = arith.constant 0.000000e+00 : f32
    %69 = vector.broadcast %cst_13 : f32 to vector<4x256xf32>
    %70 = arith.select %4, %68, %69 : vector<4x256xi1>, vector<4x256xf32>
    %71 = vector.extract_strided_slice %59 {offsets = [0, 241], sizes = [4, 15], strides = [1, 1]} : vector<4x256xf32> to vector<4x15xf32>
    %72 = vector.extract_strided_slice %59 {offsets = [0, 0], sizes = [4, 241], strides = [1, 1]} : vector<4x256xf32> to vector<4x241xf32>
    %73 = tpu.concatenate %71, %72 in 1 : vector<4x15xf32>, vector<4x241xf32> -> vector<4x256xf32>
    %74 = arith.andi %4, %10 : vector<4x256xi1>
    %cst_14 = arith.constant 0.000000e+00 : f32
    %75 = vector.broadcast %cst_14 : f32 to vector<4x256xf32>
    %76 = arith.select %74, %73, %75 : vector<4x256xi1>, vector<4x256xf32>
    %77 = vector.extract_strided_slice %59 {offsets = [0, 255], sizes = [4, 1], strides = [1, 1]} : vector<4x256xf32> to vector<4x1xf32>
    %78 = vector.extract_strided_slice %59 {offsets = [0, 0], sizes = [4, 255], strides = [1, 1]} : vector<4x256xf32> to vector<4x255xf32>
    %79 = tpu.concatenate %77, %78 in 1 : vector<4x1xf32>, vector<4x255xf32> -> vector<4x256xf32>
    %cst_15 = arith.constant 0.000000e+00 : f32
    %80 = vector.broadcast %cst_15 : f32 to vector<4x256xf32>
    %81 = arith.select %8, %79, %80 : vector<4x256xi1>, vector<4x256xf32>
    %82 = vector.extract_strided_slice %59 {offsets = [0, 1], sizes = [4, 255], strides = [1, 1]} : vector<4x256xf32> to vector<4x255xf32>
    %83 = vector.extract_strided_slice %59 {offsets = [0, 0], sizes = [4, 1], strides = [1, 1]} : vector<4x256xf32> to vector<4x1xf32>
    %84 = tpu.concatenate %82, %83 in 1 : vector<4x255xf32>, vector<4x1xf32> -> vector<4x256xf32>
    %cst_16 = arith.constant 0.000000e+00 : f32
    %85 = vector.broadcast %cst_16 : f32 to vector<4x256xf32>
    %86 = arith.select %10, %84, %85 : vector<4x256xi1>, vector<4x256xf32>
    %87 = vector.extract_strided_slice %59 {offsets = [0, 15], sizes = [4, 241], strides = [1, 1]} : vector<4x256xf32> to vector<4x241xf32>
    %88 = vector.extract_strided_slice %59 {offsets = [0, 0], sizes = [4, 15], strides = [1, 1]} : vector<4x256xf32> to vector<4x15xf32>
    %89 = tpu.concatenate %87, %88 in 1 : vector<4x241xf32>, vector<4x15xf32> -> vector<4x256xf32>
    %90 = arith.andi %6, %8 : vector<4x256xi1>
    %cst_17 = arith.constant 0.000000e+00 : f32
    %91 = vector.broadcast %cst_17 : f32 to vector<4x256xf32>
    %92 = arith.select %90, %89, %91 : vector<4x256xi1>, vector<4x256xf32>
    %93 = vector.extract_strided_slice %59 {offsets = [0, 16], sizes = [4, 240], strides = [1, 1]} : vector<4x256xf32> to vector<4x240xf32>
    %94 = vector.extract_strided_slice %59 {offsets = [0, 0], sizes = [4, 16], strides = [1, 1]} : vector<4x256xf32> to vector<4x16xf32>
    %95 = tpu.concatenate %93, %94 in 1 : vector<4x240xf32>, vector<4x16xf32> -> vector<4x256xf32>
    %cst_18 = arith.constant 0.000000e+00 : f32
    %96 = vector.broadcast %cst_18 : f32 to vector<4x256xf32>
    %97 = arith.select %6, %95, %96 : vector<4x256xi1>, vector<4x256xf32>
    %98 = vector.extract_strided_slice %59 {offsets = [0, 17], sizes = [4, 239], strides = [1, 1]} : vector<4x256xf32> to vector<4x239xf32>
    %99 = vector.extract_strided_slice %59 {offsets = [0, 0], sizes = [4, 17], strides = [1, 1]} : vector<4x256xf32> to vector<4x17xf32>
    %100 = tpu.concatenate %98, %99 in 1 : vector<4x239xf32>, vector<4x17xf32> -> vector<4x256xf32>
    %101 = arith.andi %6, %10 : vector<4x256xi1>
    %cst_19 = arith.constant 0.000000e+00 : f32
    %102 = vector.broadcast %cst_19 : f32 to vector<4x256xf32>
    %103 = arith.select %101, %100, %102 : vector<4x256xi1>, vector<4x256xf32>
    %104 = tpu.concatenate %65, %70, %76, %81, %59, %86, %92, %97, %103 in 0 : vector<4x256xf32>, vector<4x256xf32>, vector<4x256xf32>, vector<4x256xf32>, vector<4x256xf32>, vector<4x256xf32>, vector<4x256xf32>, vector<4x256xf32>, vector<4x256xf32> -> vector<36x256xf32>
    %105 = tpu.concatenate %57, %104 in 1 : vector<36x256xf32>, vector<36x256xf32> -> vector<36x512xf32>
    %c0_20 = arith.constant 0 : index
    %c0_21 = arith.constant 0 : index
    %106 = vector.load %arg2[%c0_20, %c0_21] : memref<16x36xf32, #tpu.memory_space<vmem>>, vector<16x36xf32>
    %cst_22 = arith.constant dense<0.000000e+00> : vector<16x512xf32>
    %107 = tpu.matmul %106, %105, %cst_22 {dimension_numbers = #tpu.dot_dimension_numbers<[1], [0], [0], [1], [0, 0, 1, 1], [], []>} : vector<16x36xf32>, vector<36x512xf32>, vector<16x512xf32> -> vector<16x512xf32>
    %c0_23 = arith.constant 0 : index
    %c0_24 = arith.constant 0 : index
    %108 = vector.load %arg3[%c0_23, %c0_24] : memref<16x1xf32, #tpu.memory_space<vmem>>, vector<16x1xf32>
    %109 = vector.broadcast %108 : vector<16x1xf32> to vector<16x512xf32>
    %110 = arith.addf %107, %109 : vector<16x512xf32>
    %111 = vector.extract_strided_slice %110 {offsets = [0, 0], sizes = [16, 256], strides = [1, 1]} : vector<16x512xf32> to vector<16x256xf32>
    %c0_25 = arith.constant 0 : index
    %c0_26 = arith.constant 0 : index
    %c0_27 = arith.constant 0 : index
    %112 = vector.load %arg4[%c0_25, %c0_26, %c0_27] : memref<2x16x256xf32, #tpu.memory_space<vmem>>, vector<1x16x256xf32>
    %113 = vector.shape_cast %112 : vector<1x16x256xf32> to vector<16x256xf32>
    %114 = vector.shape_cast %111 : vector<16x256xf32> to vector<1x16x256xf32>
    tpu.vector_store %arg4[%c0_25, %c0_26, %c0_27], %114 {strides = array<i32>} : memref<2x16x256xf32, #tpu.memory_space<vmem>>, vector<1x16x256xf32>,
    %115 = vector.extract_strided_slice %110 {offsets = [0, 256], sizes = [16, 256], strides = [1, 1]} : vector<16x512xf32> to vector<16x256xf32>
    %c1_28 = arith.constant 1 : index
    %c0_29 = arith.constant 0 : index
    %c0_30 = arith.constant 0 : index
    %116 = vector.load %arg4[%c1_28, %c0_29, %c0_30] : memref<2x16x256xf32, #tpu.memory_space<vmem>>, vector<1x16x256xf32>
    %117 = vector.shape_cast %116 : vector<1x16x256xf32> to vector<16x256xf32>
    %118 = vector.shape_cast %115 : vector<16x256xf32> to vector<1x16x256xf32>
    tpu.vector_store %arg4[%c1_28, %c0_29, %c0_30], %118 {strides = array<i32>} : memref<2x16x256xf32, #tpu.memory_space<vmem>>, vector<1x16x256xf32>,
    return
  }
  func.func @transform_0(%arg0: i32) -> (i32, i32, i32) {
    %c0_i32 = arith.constant 0 : i32
    %c0_i32_0 = arith.constant 0 : i32
    %c0_i32_1 = arith.constant 0 : i32
    return %arg0, %c0_i32, %c0_i32_0 : i32, i32, i32
  }
  func.func @transform_1(%arg0: i32) -> (i32, i32) {
    %c0_i32 = arith.constant 0 : i32
    %c0_i32_0 = arith.constant 0 : i32
    %c0_i32_1 = arith.constant 0 : i32
    return %c0_i32, %c0_i32_0 : i32, i32
  }
  func.func @transform_2(%arg0: i32) -> (i32, i32) {
    %c0_i32 = arith.constant 0 : i32
    %c0_i32_0 = arith.constant 0 : i32
    %c0_i32_1 = arith.constant 0 : i32
    return %c0_i32, %c0_i32_0 : i32, i32
  }
  func.func @transform_3(%arg0: i32) -> (i32, i32, i32) {
    %c0_i32 = arith.constant 0 : i32
    %c0_i32_0 = arith.constant 0 : i32
    %c0_i32_1 = arith.constant 0 : i32
    return %arg0, %c0_i32, %c0_i32_0 : i32, i32, i32
  }
}

</mosaic_0001>

<bundles_post_ra>
// kernel: tile.0
= control target key start
LH: loop header
LB: loop body
LE: loop exit
PB: predicated region body
PF: predicated region fallthrough
CT: control target
= control target key end

     0   :  { %s34_s8 = smov 125   ;;  %s35_s9 = smov 126   ;;  %vm7_vm0 = vcmask 7168   ;;  %s61_s0 = inlined_call_operand.vmem [shape: f32[4,4], index: 0, kind: input, shape index: {}]   ;;  %s62_s1 = inlined_call_operand.vmem [shape: f32[16,1], index: 1, kind: output, shape index: {}]  }
   0x1   :  { %v4_v0 = vld [vmem:[%s61_s0] sm:$0xf]  ;;  %s33_s0 = smov 127  }
   0x2   :  { %5 = vst [vmem:[#allocation0] sm:$0xf] %v4_v0 }
   0x9   :  { %v9_v1 = vld [vmem:[#allocation0] sm:$0xf]  }
   0xa   :  { %v21_v2 = vld [vmem:[#allocation0] sm:$0xf]   ;;  %10 = vrot.lane.b32.xlu0 %v9_v1, %s33_s0 }
   0xb   :  { %22 = vrot.lane.b32.xlu1 %v21_v2, %s34_s8  ;;  %v15_v3 = vld [vmem:[#allocation0] sm:$0xf]  }
   0xc   :  { %v6_v4 = vld [vmem:[#allocation0] sm:$0xf]  }
   0xd   :  { %8 = vst.msk [vmem:[%s62_s1] ss:$4 sm:$0xf] %vm7_vm0, %v6_v4  }
  0x12   :  { %16 = vrot.lane.b32.xlu0 %v15_v3, %s35_s9 }
  0x7c   :  { %v11_v5 = vpop.permute.xlu0 %10  }
  0x7d   :  { %v23_v6 = vpop.permute.xlu1 %22   ;;  %27 = vst.msk [vmem:[%s62_s1 + $0x1] ss:$4 sm:$0xf] %vm7_vm0, %v11_v5  }
  0x7e   :  { %29 = vst.msk [vmem:[%s62_s1 + $0x3] ss:$4 sm:$0xf] %vm7_vm0, %v23_v6  }
  0x84   :  { %v17_v7 = vpop.permute.xlu0 %16  }
  0x85   :  { %28 = vst.msk [vmem:[%s62_s1 + $0x2] ss:$4 sm:$0xf] %vm7_vm0, %v17_v7  }

// kernel: tile.8
= control target key start
LH: loop header
LB: loop body
LE: loop exit
PB: predicated region body
PF: predicated region fallthrough
CT: control target
= control target key end

     0   :  { %s22_s0 = inlined_call_operand.vmem [shape: f32[4], index: 0, kind: input, shape index: {}]   ;;  %s23_s1 = inlined_call_operand.vmem [shape: f32[4,4], index: 1, kind: output, shape index: {}]  }
   0x1   :  { %v4_v0 = vld [vmem:[%s22_s0] ss:$0 sm:$0xff] }
   0x2   :  { %5 = vst [vmem:[%s23_s1] sm:$0xf] %v4_v0 }

// kernel: upsample_forward.1
= control target key start
LH: loop header
LB: loop body
LE: loop exit
PB: predicated region body
PF: predicated region fallthrough
CT: control target
= control target key end

     0   :  { %s682_s14 = smov 111   ;;  %s683_s17 = smov 113   ;;  %vm175_vm0 = vcmask 908288   ;;  %vm218_vm2 = vcmask 1043456   ;;  %vm116_vm6 = vcmask 1039360   ;;  %vm135_vm7 = vcmask 924672   ;;  %s1081_s0 = inlined_call_operand.vmem [shape: f32[2,4,256], index: 0, kind: input, shape index: {}]   ;;  %s1082_s2 = inlined_call_operand.vmem [shape: f32[16,1], index: 2, kind: input, shape index: {}]   ;;  %s1083_s1 = inlined_call_operand.vmem [shape: f32[16,36], index: 1, kind: input, shape index: {}]   ;;  %s1084_s3 = inlined_call_operand.vmem [shape: f32[2,16,256], index: 3, kind: output, shape index: {}]  }
   0x1   :  { %v27_v0 = vld [vmem:[%s1081_s0] sm:$0xff]  ;;  %v748_v25 = vld [vmem:[%s1081_s0 + $0x8] sm:$0xff]  ;;  %s684_s0 = smov 127   ;;  %s685_s18 = smov 112   ;;  %vm156_vm8 = vcmask 916480   ;;  %vm102_vm12 = vcmask 7168  }
   0x2   :  { %29 = vst [vmem:[#allocation1] ss:$2 sm:$0xff] %v27_v0  ;;  %s686_s19 = smov 16   ;;  %s687_s20 = smov 15   ;;  %vm81_vm13 = vcmask 121856   ;;  %vm62_vm14 = vcmask 130048  }
   0x3   :  { %s688_s21 = smov 1   ;;  %s689_s22 = smov 17  }
   0x9   :  { %v714_v1 = vld.sshfl [vmem:[#allocation1 + $0x8] sm:$0xff pattern:$0x75316420] }
   0xa   :  { %34 = vst [vmem:[#allocation1] ss:$2 sm:$0xff] %v27_v0 }
  0x11   :  { %v716_v2 = vld.sshfl [vmem:[#allocation1] sm:$0xff pattern:$0x75316420]  ;;  %v718_v3 = vld.sshfl [vmem:[#allocation1 + $0x8] sm:$0xff pattern:$0x75316420] }
  0x12   :  { %50 = vst [vmem:[#allocation1] ss:$2 sm:$0xff] %v27_v0 }
  0x19   :  { %v720_v4 = vld.sshfl [vmem:[#allocation1 + $0x8] sm:$0xff pattern:$0x75316420] }
  0x1a   :  { %55 = vst [vmem:[#allocation1] ss:$2 sm:$0xff] %v27_v0 }
  0x21   :  { %v722_v5 = vld.sshfl [vmem:[#allocation1] sm:$0xff pattern:$0x75316420]  ;;  %v724_v6 = vld.sshfl [vmem:[#allocation1 + $0x8] sm:$0xff pattern:$0x75316420] }
  0x22   :  { %69 = vst [vmem:[#allocation1] ss:$2 sm:$0xff] %v27_v0 }
  0x29   :  { %v726_v7 = vld.sshfl [vmem:[#allocation1 + $0x8] sm:$0xff pattern:$0x75316420] }
  0x2a   :  { %74 = vst [vmem:[#allocation1] ss:$2 sm:$0xff] %v27_v0 }
  0x31   :  { %v728_v8 = vld.sshfl [vmem:[#allocation1] sm:$0xff pattern:$0x75316420]  ;;  %v730_v9 = vld.sshfl [vmem:[#allocation1 + $0x8] sm:$0xff pattern:$0x75316420] }
  0x32   :  { %90 = vst [vmem:[#allocation1] ss:$2 sm:$0xff] %v27_v0 }
  0x39   :  { %v732_v10 = vld.sshfl [vmem:[#allocation1 + $0x8] sm:$0xff pattern:$0x75316420] }
  0x3a   :  { %95 = vst [vmem:[#allocation1] ss:$2 sm:$0xff] %v27_v0 }
  0x41   :  { %v734_v11 = vld.sshfl [vmem:[#allocation1] sm:$0xff pattern:$0x75316420]  ;;  %v736_v12 = vld.sshfl [vmem:[#allocation1 + $0x8] sm:$0xff pattern:$0x75316420] }
  0x42   :  { %109 = vst [vmem:[#allocation1] ss:$2 sm:$0xff] %v27_v0 }
  0x49   :  { %v738_v13 = vld.sshfl [vmem:[#allocation1] sm:$0xff pattern:$0x75316420]  ;;  %v111_v14 = vld.sshfl [vmem:[#allocation1 + $0x8] sm:$0xff pattern:$0x75316420] }
  0x4a   :  { %120 = vst [vmem:[#allocation1] ss:$2 sm:$0xff] %v27_v0 }
  0x51   :  { %v121_v15 = vld.sshfl [vmem:[#allocation1] sm:$0xff pattern:$0x75316420] }
  0x52   :  { %128 = vst [vmem:[#allocation1] ss:$2 sm:$0xff] %v27_v0  ;;  %v575_v32 = vpack.i.bf16 %v121_v15, %v111_v14  ;;  %v660_v15 = vpack.i.bf16 %v736_v12, %v734_v11 }
  0x54   :  { %576 = vrot.lane.b32.xlu1 %v575_v32, %s684_s0 }
  0x59   :  { %v740_v16 = vld.sshfl [vmem:[#allocation1] sm:$0xff pattern:$0x75316420]  ;;  %v130_v17 = vld.sshfl [vmem:[#allocation1 + $0x8] sm:$0xff pattern:$0x75316420] }
  0x5a   :  { %139 = vst [vmem:[#allocation1] ss:$2 sm:$0xff] %v27_v0 }
  0x61   :  { %v140_v18 = vld.sshfl [vmem:[#allocation1] sm:$0xff pattern:$0x75316420] }
  0x62   :  { %149 = vst [vmem:[#allocation1] ss:$2 sm:$0xff] %v27_v0  ;;  %v580_v28 = vpack.i.bf16 %v140_v18, %v130_v17 }
  0x64   :  { %581 = vrot.lane.b32.xlu2 %v580_v28, %s683_s17 }
  0x69   :  { %v150_v19 = vld.sshfl [vmem:[#allocation1] sm:$0xff pattern:$0x75316420]  ;;  %v742_v20 = vld.sshfl [vmem:[#allocation1 + $0x8] sm:$0xff pattern:$0x75316420] }
  0x6a   :  { %160 = vst [vmem:[#allocation1] ss:$2 sm:$0xff] %v27_v0 }
  0x71   :  { %v161_v21 = vld.sshfl [vmem:[#allocation1] sm:$0xff pattern:$0x75316420] }
  0x72   :  { %168 = vst [vmem:[#allocation1] ss:$2 sm:$0xff] %v27_v0  ;;  %v585_v33 = vpack.i.bf16 %v150_v19, %v161_v21  ;;  %v14_v19 = vlaneseq }
  0x74   :  { %586 = vrot.lane.b32.xlu2 %v585_v33, %s685_s18 }
  0x79   :  { %v169_v22 = vld.sshfl [vmem:[#allocation1] sm:$0xff pattern:$0x75316420]  ;;  %v170_v23 = vld.sshfl [vmem:[#allocation1 + $0x8] sm:$0xff pattern:$0x75316420] }
  0x7a   :  { %171 = vrot.lane.b32.xlu0 %v169_v22, %s682_s14  ;;  %179 = vst [vmem:[#allocation1] ss:$2 sm:$0xff] %v27_v0  ;;  %173 = vrot.lane.b32.xlu1 %v170_v23, %s682_s14 }
  0x81   :  { %v180_v24 = vld.sshfl [vmem:[#allocation1] sm:$0xff pattern:$0x75316420] }
  0x82   :  { %201 = vst [vmem:[#allocation1] ss:$2 sm:$0xff] %v27_v0  ;;  %181 = vrot.lane.b32.xlu2 %v180_v24, %s682_s14 }
  0x89   :  { %v750_v26 = vld.sshfl [vmem:[#allocation1] sm:$0xff pattern:$0x75316420]  ;;  %v752_v27 = vld.sshfl [vmem:[#allocation1 + $0x8] sm:$0xff pattern:$0x75316420] }
  0x8a   :  { %230 = vst [vmem:[#allocation1] ss:$2 sm:$0xff] %v748_v25 }
  0x91   :  { %v756_v29 = vld.sshfl [vmem:[#allocation1 + $0x8] sm:$0xff pattern:$0x75316420] }
  0x92   :  { %235 = vst [vmem:[#allocation1] ss:$2 sm:$0xff] %v748_v25 }
  0x99   :  { %v759_v30 = vld.sshfl [vmem:[#allocation1] sm:$0xff pattern:$0x75316420]  ;;  %v761_v31 = vld.sshfl [vmem:[#allocation1 + $0x8] sm:$0xff pattern:$0x75316420] }
  0x9a   :  { %248 = vst [vmem:[#allocation1] ss:$2 sm:$0xff] %v748_v25  ;;  %v650_v0 = vpack.i.bf16 %v759_v30, %v756_v29  ;;  %v655_v14 = vpack.i.bf16 %v714_v1, %v761_v31  ;;  %v818_v1 = vand.u32 127, %v14_v19 }
  0x9c   :  { %v17_v11 = vand.u32 15, %v818_v1  ;;  %v822_v12 = vadd.s32 128, %v818_v1  ;;  %vm19_vm15 = vcmp.ge.s32.totalorder %v818_v1, 16 }
  0x9e   :  { %vm824_vm1 = vcmp.lt.s32.totalorder %v17_v11, 15  ;;  %vm22_vm3 = vcmp.lt.s32.totalorder %v822_v12, 240  ;;  %vm878_vm10 = vcmp.ge.s32.totalorder %v17_v11, 1 }
  0xa1   :  { %v249_v34 = vld.sshfl [vmem:[#allocation1 + $0x8] sm:$0xff pattern:$0x75316420] }
  0xa2   :  { %253 = vst [vmem:[#allocation1] ss:$2 sm:$0xff] %v748_v25 }
  0xa9   :  { %v254_v35 = vld.sshfl [vmem:[#allocation1] sm:$0xff pattern:$0x75316420]  ;;  %v255_v36 = vld.sshfl [vmem:[#allocation1 + $0x8] sm:$0xff pattern:$0x75316420] }
  0xaa   :  { %v590_v37 = vpack.i.bf16 %v254_v35, %v249_v34  ;;  %266 = vst [vmem:[#allocation1] ss:$2 sm:$0xff] %v748_v25  ;;  %v595_v38 = vpack.i.bf16 %v720_v4, %v255_v36 }
  0xac   :  { %591 = vrot.lane.b32.xlu0 %v590_v37, %s686_s19 }
  0xb1   :  { %v267_v39 = vld.sshfl [vmem:[#allocation1 + $0x8] sm:$0xff pattern:$0x75316420] }
  0xb2   :  { %271 = vst [vmem:[#allocation1] ss:$2 sm:$0xff] %v748_v25 }
  0xb4   :  { %596 = vrot.lane.b32.xlu0 %v595_v38, %s686_s19 }
  0xb9   :  { %v272_v40 = vld.sshfl [vmem:[#allocation1] sm:$0xff pattern:$0x75316420]  ;;  %v273_v41 = vld.sshfl [vmem:[#allocation1 + $0x8] sm:$0xff pattern:$0x75316420] }
  0xba   :  { %284 = vst [vmem:[#allocation1] ss:$2 sm:$0xff] %v748_v25  ;;  %v600_v42 = vpack.i.bf16 %v272_v40, %v267_v39  ;;  %v605_v44 = vpack.i.bf16 %v726_v7, %v273_v41 }
  0xbc   :  { %601 = vrot.lane.b32.xlu1 %v600_v42, %s687_s20  ;;  %606 = vrot.lane.b32.xlu2 %v605_v44, %s687_s20 }
  0xc1   :  { %v285_v43 = vld.sshfl [vmem:[#allocation1 + $0x8] sm:$0xff pattern:$0x75316420] }
  0xc2   :  { %289 = vst [vmem:[#allocation1] ss:$2 sm:$0xff] %v748_v25 }
  0xc6   :  { %v577_v17 = vpop.permute.xlu1 %576 }
  0xc7   :  { %v579_v37 = vunpack.i.h.bf16 %v577_v17  ;;  %v578_v38 = vunpack.i.l.bf16 %v577_v17 }
  0xc9   :  { %v290_v45 = vld.sshfl [vmem:[#allocation1] sm:$0xff pattern:$0x75316420]  ;;  %v291_v46 = vld.sshfl [vmem:[#allocation1 + $0x8] sm:$0xff pattern:$0x75316420] }
  0xca   :  { %v610_v47 = vpack.i.bf16 %v290_v45, %v285_v43  ;;  %302 = vst [vmem:[#allocation1] ss:$2 sm:$0xff] %v748_v25  ;;  %v615_v48 = vpack.i.bf16 %v732_v10, %v291_v46  ;;  %v665_v10 = vpack.i.bf16 %v724_v6, %v722_v5  ;;  %v670_v5 = vpack.i.bf16 %v730_v9, %v728_v8 }
  0xcb   :  { %v675_v6 = vpack.i.bf16 %v718_v3, %v716_v2  ;;  %v18_v3 = vand.u32 15, %v822_v12  ;;  %v125_v45 = vsel %vm116_vm6, %v578_v38, %v579_v37 }
  0xcc   :  { %611 = vrot.lane.b32.xlu0 %v610_v47, %s688_s21  ;;  %616 = vrot.lane.b32.xlu1 %v615_v48, %s688_s21 }
  0xcd   :  { %vm834_vm4 = vcmp.lt.s32.totalorder %v18_v3, 15  ;;  %vm872_vm9 = vcmp.ge.s32.totalorder %v18_v3, 1 }
  0xce   :  { %vm843_vm5 = vmand %vm22_vm3, %vm834_vm4 }
  0xcf   :  { %vm891_vm11 = vmand %vm22_vm3, %vm872_vm9 }
  0xd1   :  { %v303_v49 = vld.sshfl [vmem:[#allocation1] sm:$0xff pattern:$0x75316420]  ;;  %v304_v50 = vld.sshfl [vmem:[#allocation1 + $0x8] sm:$0xff pattern:$0x75316420] }
  0xd2   :  { %312 = vst [vmem:[#allocation1] ss:$2 sm:$0xff] %v748_v25  ;;  %v620_v51 = vpack.i.bf16 %v304_v50, %v303_v49 }
  0xd4   :  { %621 = vrot.lane.b32.xlu2 %v620_v51, %s684_s0 }
  0xd9   :  { %v313_v52 = vld.sshfl [vmem:[#allocation1] sm:$0xff pattern:$0x75316420] }
  0xda   :  { %v625_v53 = vpack.i.bf16 %v738_v13, %v313_v52  ;;  %320 = vst [vmem:[#allocation1] ss:$2 sm:$0xff] %v748_v25 }
  0xdc   :  { %626 = vrot.lane.b32.xlu0 %v625_v53, %s684_s0 }
  0xe1   :  { %v321_v54 = vld.sshfl [vmem:[#allocation1] sm:$0xff pattern:$0x75316420]  ;;  %v322_v55 = vld.sshfl [vmem:[#allocation1 + $0x8] sm:$0xff pattern:$0x75316420] }
  0xe2   :  { %330 = vst [vmem:[#allocation1] ss:$2 sm:$0xff] %v748_v25  ;;  %v630_v56 = vpack.i.bf16 %v322_v55, %v321_v54  ;;  %v127_v54 = vsel %vm834_vm4, %v125_v45, 0.0 }
  0xe4   :  { %631 = vrot.lane.b32.xlu1 %v630_v56, %s683_s17 }
  0xe9   :  { %v331_v57 = vld.sshfl [vmem:[#allocation1] sm:$0xff pattern:$0x75316420] }
  0xea   :  { %v635_v58 = vpack.i.bf16 %v740_v16, %v331_v57  ;;  %338 = vst [vmem:[#allocation1] ss:$2 sm:$0xff] %v748_v25  ;;  %v582_v16 = vpop.permute.xlu2 %581 }
  0xeb   :  { %v583_v41 = vunpack.i.l.bf16 %v582_v16  ;;  %v584_v44 = vunpack.i.h.bf16 %v582_v16 }
  0xec   :  { %636 = vrot.lane.b32.xlu2 %v635_v58, %s683_s17  ;;  %v174_v21 = vpop.permute.xlu1 %173 }
  0xed   :  { %v144_v56 = vsel %vm135_vm7, %v583_v41, %v584_v44 }
  0xf1   :  { %v339_v59 = vld.sshfl [vmem:[#allocation1] sm:$0xff pattern:$0x75316420]  ;;  %v340_v60 = vld.sshfl [vmem:[#allocation1 + $0x8] sm:$0xff pattern:$0x75316420] }
  0xf2   :  { %v640_v61 = vpack.i.bf16 %v742_v20, %v339_v59  ;;  %348 = vst [vmem:[#allocation1] ss:$2 sm:$0xff] %v748_v25  ;;  %v587_v18 = vpop.permute.xlu2 %586  ;;  %v172_v20 = vpop.permute.xlu0 %171 }
  0xf3   :  { %v176_v2 = vsel %vm175_vm0, %v172_v20, %v174_v21  ;;  %v589_v48 = vunpack.i.h.bf16 %v587_v18  ;;  %v588_v49 = vunpack.i.l.bf16 %v587_v18 }
  0xf4   :  { %641 = vrot.lane.b32.xlu0 %v640_v61, %s685_s18  ;;  %v187_v9 = vsel %vm824_vm1, %v176_v2, 0.0 }
  0xf5   :  { %550 = vmatpush.msk.msra.mxu0 %vm218_vm2, %v187_v9 }
  0xf9   :  { %v349_v62 = vld.sshfl [vmem:[#allocation1] sm:$0xff pattern:$0x75316420] }
  0xfa   :  { %v645_v63 = vpack.i.bf16 %v349_v62, %v340_v60  ;;  %356 = vst [vmem:[#allocation1] ss:$2 sm:$0xff] %v748_v25  ;;  %v182_v22 = vpop.permute.xlu2 %181 }
  0xfb   :  { %v184_v24 = vsel %vm175_vm0, %v174_v21, %v182_v22 }
  0xfc   :  { %646 = vrot.lane.b32.xlu0 %v645_v63, %s685_s18  ;;  %v188_v28 = vsel %vm843_vm5, %v184_v24, 0.0 }
  0xfd   :  { %553 = vmatpush.msk.msra.mxu1 %vm218_vm2, %v188_v28 }
 0x101   :  { %v357_v4 = vld.sshfl [vmem:[#allocation1] sm:$0xff pattern:$0x75316420]  ;;  %v358_v7 = vld.sshfl [vmem:[#allocation1 + $0x8] sm:$0xff pattern:$0x75316420] }
 0x102   :  { %359 = vrot.lane.b32.xlu1 %v357_v4, %s682_s14  ;;  %366 = vst [vmem:[#allocation1] ss:$2 sm:$0xff] %v748_v25  ;;  %v209_v4 = vrot.slane %v127_v54, 4 }
 0x104   :  { %651 = vrot.lane.b32.xlu0 %v650_v0, %s689_s22 }
 0x109   :  { %v367_v13 = vld.sshfl [vmem:[#allocation1] sm:$0xff pattern:$0x75316420] }
 0x10a   :  { %361 = vrot.lane.b32.xlu1 %v358_v7, %s682_s14  ;;  %368 = vrot.lane.b32.xlu2 %v367_v13, %s682_s14  ;;  %386 = vst [vmem:[#allocation1] ss:$2 sm:$0xff] %v748_v25 }
 0x10c   :  { %666 = vrot.lane.b32.xlu0 %v665_v10, %s686_s19  ;;  %v148_v10 = vsel %vm891_vm11, %v144_v56, 0.0 }
 0x112   :  { %656 = vrot.lane.b32.xlu1 %v655_v14, %s689_s22  ;;  %661 = vrot.lane.b32.xlu2 %v660_v15, %s688_s21 }
 0x116   :  { %v854_v31 = vpop.permute.xlu2 %606 }
 0x117   :  { %v608_v9 = vunpack.i.l.bf16 %v854_v31 }
 0x11a   :  { %671 = vrot.lane.b32.xlu1 %v670_v5, %s687_s20  ;;  %676 = vrot.lane.b32.xlu2 %v675_v6, %s689_s22  ;;  %v224_v5 = vsel %vm218_vm2, %v752_v27, %v209_v4 }
 0x11e   :  { %v850_v29 = vpop.permute.xlu0 %591 }
 0x11f   :  { %v594_v19 = vunpack.i.h.bf16 %v850_v29  ;;  %v593_v20 = vunpack.i.l.bf16 %v850_v29  ;;  %v411_v29 = vld [vmem:[%s1083_s1] sm:$0xff] }
 0x126   :  { %v852_v30 = vpop.permute.xlu0 %596 }
 0x12e   :  { %v858_v33 = vpop.permute.xlu2 %621  ;;  %v860_v34 = vpop.permute.xlu1 %601 }
 0x12f   :  { %v623_v21 = vunpack.i.l.bf16 %v858_v33  ;;  %v604_v22 = vunpack.i.h.bf16 %v860_v34  ;;  %v603_v24 = vunpack.i.l.bf16 %v860_v34 }
 0x131   :  { %v281_v45 = vsel %vm81_vm13, %v603_v24, %v604_v22 }
 0x13e   :  { %v856_v32 = vpop.permute.xlu0 %611  ;;  %v867_v40 = vpop.permute.xlu1 %616 }
 0x13f   :  { %v614_v6 = vunpack.i.h.bf16 %v856_v32  ;;  %v613_v16 = vunpack.i.l.bf16 %v856_v32  ;;  %v618_v11 = vunpack.i.l.bf16 %v867_v40 }
 0x146   :  { %v865_v39 = vpop.permute.xlu2 %636 }
 0x147   :  { %v639_v42 = vunpack.i.h.bf16 %v865_v39  ;;  %v638_v37 = vunpack.i.l.bf16 %v865_v39  ;;  %v263_v39 = vsel %vm62_vm14, %v593_v20, %v594_v19 }
 0x149   :  { %v136_v53 = vsel %vm135_vm7, %v639_v42, %v583_v41 }
 0x14a   :  { %v147_v63 = vsel %vm878_vm10, %v136_v53, 0.0 }
 0x14e   :  { %v862_v35 = vpop.permute.xlu0 %626 }
 0x14f   :  { %v629_v36 = vunpack.i.h.bf16 %v862_v35  ;;  %v628_v27 = vunpack.i.l.bf16 %v862_v35  ;;  %v296_v35 = vsel %vm102_vm12, %v614_v6, %v618_v11 }
 0x151   :  { %v117_v43 = vsel %vm116_vm6, %v629_v36, %v578_v38  ;;  %v299_v36 = vsel %vm102_vm12, %v613_v16, %v614_v6  ;;  %v598_v6 = vunpack.i.l.bf16 %v852_v30  ;;  %v387_v16 = vld.sshfl [vmem:[#allocation1] sm:$0xff pattern:$0x75316420] }
 0x152   :  { %v126_v51 = vsel %vm824_vm1, %v117_v43, 0.0 }
 0x153   :  { %v208_v62 = vrot.slane %v126_v51, 4  ;;  %v260_v24 = vsel %vm62_vm14, %v594_v19, %v598_v6  ;;  %v619_v19 = vunpack.i.h.bf16 %v867_v40 }
 0x155   :  { %v223_v14 = vsel %vm218_vm2, %v750_v26, %v208_v62  ;;  %v624_v26 = vunpack.i.h.bf16 %v858_v33  ;;  %v388_v62 = vld.sshfl [vmem:[#allocation1 + $0x8] sm:$0xff pattern:$0x75316420] }
 0x156   :  { %v632_v59 = vpop.permute.xlu1 %631 }
 0x157   :  { %v634_v33 = vunpack.i.h.bf16 %v632_v59  ;;  %v633_v38 = vunpack.i.l.bf16 %v632_v59  ;;  %v309_v41 = vsel %vm116_vm6, %v623_v21, %v624_v26  ;;  %v317_v42 = vsel %vm116_vm6, %v624_v26, %v628_v27 }
 0x158   :  { %v318_v51 = vsel %vm824_vm1, %v309_v41, 0.0  ;;  %v319_v53 = vsel %vm834_vm4, %v317_v42, 0.0 }
 0x159   :  { %v335_v12 = vsel %vm135_vm7, %v634_v33, %v638_v37 }
 0x15a   :  { %v337_v8 = vsel %vm891_vm11, %v335_v12, 0.0 }
 0x164   :  { %v369_v2 = vpop.permute.xlu2 %368 }
 0x166   :  { %v642_v46 = vpop.permute.xlu0 %641 }
 0x167   :  { %v644_v50 = vunpack.i.h.bf16 %v642_v46  ;;  %v643_v28 = vunpack.i.l.bf16 %v642_v46  ;;  %v300_v46 = vsel %vm878_vm10, %v299_v36, 0.0 }
 0x169   :  { %v157_v55 = vsel %vm156_vm8, %v589_v48, %v644_v50  ;;  %v165_v58 = vsel %vm156_vm8, %v644_v50, %v588_v49  ;;  %v278_v48 = vsel %vm81_vm13, %v604_v22, %v608_v9  ;;  %v301_v49 = vsel %vm872_vm9, %v296_v35, 0.0 }
 0x16a   :  { %v214_v60 = vrot.slane %v157_v55, 4  ;;  %v167_v61 = vsel %vm22_vm3, %v165_v58, 0.0  ;;  %v327_v50 = vsel %vm135_vm7, %v633_v38, %v634_v33  ;;  %v383_v20 = vrot.slane %v301_v49, 4 }
 0x16b   :  { %v215_v0 = vrot.slane %v167_v61, 4  ;;  %v336_v25 = vsel %vm878_vm10, %v327_v50, 0.0  ;;  %v283_v27 = vsel %vm834_vm4, %v278_v48, 0.0  ;;  %v377_v48 = vrot.slane %v260_v24, 4 }
 0x16c   :  { %v225_v7 = vsel %vm218_vm2, %v147_v63, %v214_v60  ;;  %v413_v63 = vld [vmem:[%s1082_s2] sm:$0xff]  ;;  %v956_v4 = vpop.permute.xlu2 %661  ;;  %v406_v33 = vsel %vm218_vm2, %v283_v27, %v383_v20  ;;  %v599_v49 = vunpack.i.h.bf16 %v852_v30 }
 0x16d   :  { %456 = vmatpush.msra.mxu0 %v225_v7  ;;  %v226_v13 = vsel %vm218_vm2, %v148_v10, %v215_v0  ;;  %v414_v0 = vld [vmem:[%s1082_s2 + $0x8] sm:$0xff]  ;;  %v664_v35 = vunpack.i.h.bf16 %v956_v4 }
 0x16e   :  { %479 = vmatpush.msra.mxu1 %v226_v13  ;;  %v647_v15 = vpop.permute.xlu0 %646  ;;  %v393_v13 = vrot.slane %v318_v51, 4 }
 0x16f   :  { %457 = vmatpush.msra.mxu0 %v223_v14  ;;  %v649_v17 = vunpack.i.h.bf16 %v647_v15  ;;  %v648_v18 = vunpack.i.l.bf16 %v647_v15  ;;  %v394_v14 = vrot.slane %v319_v53, 4 }
 0x170   :  { %480 = vmatpush.msra.mxu1 %v224_v5  ;;  %v690_v5 = vmov 0  }
 0x171   :  { %v353_v32 = vsel %vm156_vm8, %v648_v18, %v649_v17  ;;  %v345_v34 = vsel %vm156_vm8, %v643_v28, %v648_v18  ;;  %680 = vset.pattern.permute.xlu0 %v690_v5  ;;  %681 = vset.pattern.permute.xlu1 %v690_v5  ;;  %v382_v17 = vrot.slane %v300_v46, 4  ;;  %v408_v9 = vsel %vm218_vm2, %v388_v62, %v394_v14 }
 0x172   :  { %v355_v44 = vsel %vm22_vm3, %v353_v32, 0.0  ;;  %v399_v58 = vrot.slane %v345_v34, 4  ;;  %vm41_vm3 = vcmask 138240   ;;  %417 = vperm.xlu0 %680, %v413_v63   ;;  %422 = vperm.xlu1 %681, %v414_v0   ;;  %v663_v28 = vunpack.i.l.bf16 %v956_v4  ;;  %v412_v4 = vld [vmem:[%s1083_s1 + $0x8] sm:$0xff] }
 0x173   :  { %v400_v59 = vrot.slane %v355_v44, 4 }
 0x174   :  { %v360_v3 = vpop.permute.xlu1 %359  ;;  %v409_v18 = vsel %vm218_vm2, %v336_v25, %v399_v58  ;;  %v677_v34 = vpop.permute.xlu2 %676  ;;  %v106_v40 = vsel %vm102_vm12, %v619_v19, %v663_v28 }
 0x175   :  { %v410_v11 = vsel %vm218_vm2, %v337_v8, %v400_v59  ;;  %v678_v51 = vunpack.i.l.bf16 %v677_v34  ;;  %v107_v59 = vsel %vm878_vm10, %v106_v40, 0.0 }
 0x176   :  { %v925_v43 = vpop.permute.xlu0 %651 }
 0x177   :  { %v654_v54 = vunpack.i.h.bf16 %v925_v43  ;;  %v653_v55 = vunpack.i.l.bf16 %v925_v43 }
 0x179   :  { %v245_v57 = vsel %vm41_vm3, %v653_v55, %v654_v54  ;;  %v103_v55 = vsel %vm102_vm12, %v663_v28, %v664_v35 }
 0x17c   :  { %v362_v56 = vpop.permute.xlu1 %361 }
 0x17d   :  { %v363_v60 = vsel %vm175_vm0, %v360_v3, %v362_v56  ;;  %v371_v61 = vsel %vm175_vm0, %v362_v56, %v369_v2  ;;  %vm966_vm0 = vmand %vm19_vm15, %vm824_vm1  ;;  %v264_v2 = vsel %vm19_vm15, %v263_v39, 0.0  ;;  %v407_v3 = vsel %vm218_vm2, %v387_v16, %v393_v13 }
 0x17e   :  { %v372_v7 = vsel %vm824_vm1, %v363_v60, 0.0  ;;  %v373_v10 = vsel %vm843_vm5, %v371_v61, 0.0  ;;  %vm983_vm1 = vmand %vm19_vm15, %vm878_vm10  ;;  %v282_v21 = vsel %vm966_vm0, %v281_v45, 0.0  ;;  %v667_v32 = vpop.permute.xlu0 %666  ;;  %v376_v38 = vrot.slane %v264_v2, 4 }
 0x17f   :  { %556 = vmatpush.msk.msra.mxu2 %vm218_vm2, %v372_v7  ;;  %559 = vmatpush.msk.msra.mxu3 %vm218_vm2, %v373_v10  ;;  %v246_v22 = vsel %vm983_vm1, %v245_v57, 0.0  ;;  %v405_v37 = vsel %vm218_vm2, %v282_v21, %v382_v17  ;;  %vm425_vm5 = vcmask 293888   ;;  %v669_v42 = vunpack.i.h.bf16 %v667_v32 }
 0x180   :  { %v403_v44 = vsel %vm218_vm2, %v246_v22, %v376_v38  ;;  %v668_v39 = vunpack.i.l.bf16 %v667_v32  ;;  %v679_v45 = vunpack.i.h.bf16 %v677_v34  ;;  %v609_v56 = vunpack.i.h.bf16 %v854_v31 }
 0x181   :  { %502 = vmatpush.msra.mxu2 %v409_v18  ;;  %525 = vmatpush.msra.mxu3 %v410_v11  ;;  %v108_v60 = vsel %vm872_vm9, %v103_v55, 0.0  ;;  %v197_v10 = vrot.slane %v107_v59, 4 }
 0x182   :  { %v63_v43 = vsel %vm62_vm14, %v668_v39, %v669_v42  ;;  %v66_v30 = vsel %vm62_vm14, %v599_v49, %v668_v39  ;;  %v198_v14 = vrot.slane %v108_v60, 4 }
 0x183   :  { %503 = vmatpush.msra.mxu2 %v407_v3  ;;  %526 = vmatpush.msra.mxu3 %v408_v9  ;;  %v192_v0 = vrot.slane %v63_v43, 4  ;;  %v67_v7 = vsel %vm19_vm15, %v66_v30, 0.0 }
 0x184   :  { %v657_v36 = vpop.permute.xlu1 %656  ;;  %v191_v8 = vrot.slane %v67_v7, 4 }
 0x185   :  { %v658_v41 = vunpack.i.l.bf16 %v657_v36  ;;  %504 = vmatpush.msra.mxu2 %v405_v37  ;;  %527 = vmatpush.msra.mxu3 %v406_v33  ;;  %v659_v12 = vunpack.i.h.bf16 %v657_v36 }
 0x187   :  { %505 = vmatpush.msra.mxu2 %v403_v44  ;;  %v242_v46 = vsel %vm41_vm3, %v654_v54, %v658_v41  ;;  %v42_v54 = vsel %vm41_vm3, %v678_v51, %v679_v45  ;;  %v45_v63 = vsel %vm41_vm3, %v659_v12, %v678_v51 }
 0x188   :  { %v247_v50 = vsel %vm872_vm9, %v242_v46, 0.0  ;;  %557 = vmatmul.msk.f32.vlgmr.msra.gmra.mxu2 %vm425_vm5, %v411_v29  ;;  %v49_v31 = vsel %vm872_vm9, %v42_v54, 0.0  ;;  %v48_v25 = vsel %vm983_vm1, %v45_v63, 0.0 }
 0x189   :  { %v404_v53 = vsel %vm218_vm2, %v247_v50, %v377_v48  ;;  %v220_v16 = vsel %vm218_vm2, %v49_v31, %v192_v0  ;;  %v219_v15 = vsel %vm218_vm2, %v48_v25, %v191_v8 }
 0x18a   :  { %528 = vmatpush.msra.mxu3 %v404_v53 }
 0x18b   :  { %560 = vmatmul.msk.f32.vlgmr.msra.gmra.mxu3 %vm425_vm5, %v411_v29 }
 0x18c   :  { %v672_v58 = vpop.permute.xlu1 %671 }
 0x18d   :  { %v674_v61 = vunpack.i.h.bf16 %v672_v58  ;;  %v673_v62 = vunpack.i.l.bf16 %v672_v58 }
 0x18f   :  { %v85_v52 = vsel %vm81_vm13, %v609_v56, %v673_v62  ;;  %v82_v13 = vsel %vm81_vm13, %v673_v62, %v674_v61 }
 0x190   :  { %v88_v5 = vsel %vm966_vm0, %v85_v52, 0.0  ;;  %v89_v6 = vsel %vm834_vm4, %v82_v13, 0.0  ;;  %558 = vmatmul.msk.f32.gmra.mxu2 %vm425_vm5, %v412_v4 }
 0x191   :  { %v221_v1 = vsel %vm218_vm2, %v88_v5, %v197_v10  ;;  %v222_v47 = vsel %vm218_vm2, %v89_v6, %v198_v14 }
 0x192   :  { %458 = vmatpush.msra.mxu0 %v221_v1  ;;  %481 = vmatpush.msra.mxu1 %v222_v47 }
 0x193   :  { %561 = vmatmul.msk.f32.gmra.mxu3 %vm425_vm5, %v412_v4 }
 0x194   :  { %459 = vmatpush.msra.mxu0 %v219_v15  ;;  %482 = vmatpush.msra.mxu1 %v220_v16 }
 0x195   :  { %551 = vmatmul.msk.f32.vlgmr.msra.gmra.mxu0 %vm425_vm5, %v411_v29  ;;  %554 = vmatmul.msk.f32.vlgmr.msra.gmra.mxu1 %vm425_vm5, %v411_v29 }
 0x19d   :  { %552 = vmatmul.msk.f32.gmra.mxu0 %vm425_vm5, %v412_v4  ;;  %555 = vmatmul.msk.f32.gmra.mxu1 %vm425_vm5, %v412_v4 }
 0x1e4   :  { %v418_v23 = vpop.permute.xlu0 %417  ;;  %v423_v26 = vpop.permute.xlu1 %422 }
 0x20b   :  { %v507_v17 = vpop.f32.mrf.mxu2 }
 0x20c   :  { %v508_v18 = vadd.f32 %v507_v17, %v418_v23 }
 0x20e   :  { %562 = vst [vmem:[%s1084_s3 + $0x20] sm:$0xff] %v508_v18  ;;  %v530_v11 = vpop.f32.mrf.mxu3 }
 0x20f   :  { %v531_v20 = vadd.f32 %v530_v11, %v418_v23 }
 0x211   :  { %563 = vst [vmem:[%s1084_s3 + $0x28] sm:$0xff] %v531_v20 }
 0x212   :  { %v461_v57 = vpop.f32.mrf.mxu0  ;;  %v484_v21 = vpop.f32.mrf.mxu1 }
 0x213   :  { %v462_v27 = vadd.f32 %v461_v57, %v418_v23  ;;  %v485_v2 = vadd.f32 %v484_v21, %v418_v23  ;;  %v510_v3 = vpop.f32.mrf.mxu2 }
 0x214   :  { %v511_v9 = vadd.f32 %v510_v3, %v423_v26 }
 0x215   :  { %536 = vst [vmem:[%s1084_s3] sm:$0xff] %v462_v27 }
 0x216   :  { %537 = vst [vmem:[%s1084_s3 + $0x8] sm:$0xff] %v485_v2  ;;  %v533_v22 = vpop.f32.mrf.mxu3 }
 0x217   :  { %564 = vst [vmem:[%s1084_s3 + $0x30] sm:$0xff] %v511_v9  ;;  %v534_v24 = vadd.f32 %v533_v22, %v423_v26 }
 0x219   :  { %565 = vst [vmem:[%s1084_s3 + $0x38] sm:$0xff] %v534_v24 }
 0x21a   :  { %v464_v28 = vpop.f32.mrf.mxu0  ;;  %v487_v32 = vpop.f32.mrf.mxu1 }
 0x21b   :  { %v465_v36 = vadd.f32 %v464_v28, %v423_v26  ;;  %v488_v37 = vadd.f32 %v487_v32, %v423_v26 }
 0x21d   :  { %538 = vst [vmem:[%s1084_s3 + $0x10] sm:$0xff] %v465_v36 }
 0x21e   :  { %539 = vst [vmem:[%s1084_s3 + $0x18] sm:$0xff] %v488_v37 }

</bundles_post_ra>
